<compile_context>
chip_gen: v7x
topology: tpu7x:2x2x1
jax: 0.10.0
libtpu: 0.0.40
codegen_flags: <defaults>
</compile_context>

<pallas_src>
import math
import functools

import numpy as np

import jax
import jax.numpy as jnp
from jax.experimental import pallas as pl
from jax.experimental.pallas import tpu as pltpu

EPS = 1e-8


# --------------------------------------------------------------------------
# Pallas kernel
# --------------------------------------------------------------------------
def _modconv_kernel(x_ref, s_ref, sig_ref, w_ref, cmask_ref, o_ref, xw_ref,
                    *, ksize, pad, width, padl):
    # x_ref     : (1, Cin, M)          bf16, one batch element, M = H*W on lanes
    # s_ref     : (1, Cin, 1)          f32, per-(batch, in-channel) modulation
    # sig_ref   : (1, Cout_t, 1)       f32, per-(batch, out-channel) demod scale
    # w_ref     : (k, k, Cout_t, Cin)  bf16 shared equalized weight tile
    # cmask_ref : (k, 1, M)            bf16 column (W-border) validity masks
    # o_ref     : (1, Cout_t, M)       f32
    # xw_ref    : VMEM (Cin, M+2*padl) bf16, lane-padded staging scratch
    cin = x_ref.shape[1]
    m = x_ref.shape[2]
    cout_t = o_ref.shape[1]

    # Stage the modulated, zero-padded activations once per batch element.
    # The Cout-tile axis is the innermost ("arbitrary") grid axis, so co == 0
    # always runs first for each batch on each core, and the scratch persists
    # across the remaining Cout tiles of that batch.
    @pl.when(pl.program_id(1) == 0)
    def _stage():
        xm = (x_ref[0] * s_ref[0]).astype(xw_ref.dtype)          # (Cin, M)
        zpad = jnp.zeros((cin, padl), xw_ref.dtype)
        xw_ref[:, 0:padl] = zpad                                 # left zeros
        xw_ref[:, padl + m:2 * padl + m] = zpad                  # right zeros
        xw_ref[:, padl:padl + m] = xm                            # aligned store

    # One bf16 MXU matmul per tap, f32 accumulation.  (Cout_t, M) f32 acc is
    # kept in registers; the wrapper's tile choice keeps it small enough.
    acc = jnp.zeros((cout_t, m), jnp.float32)
    for kh in range(ksize):
        for kw in range(ksize):
            d = (kh - pad) * width + (kw - pad)                  # flat offset
            t = xw_ref[:, padl + d:padl + d + m]                 # (Cin, M)
            if kw != pad:
                # kill W-border wrap; H-border reads already hit the zero pads
                t = t * cmask_ref[kw]
            acc = acc + jnp.dot(w_ref[kh, kw], t,
                                preferred_element_type=jnp.float32)

    # Demodulate on the output channel; lane-dense (Cout_t, M) store.
    o_ref[0] = (acc * sig_ref[0]).astype(o_ref.dtype)


# --------------------------------------------------------------------------
# Wrapper: Conv2dWeightModulate.forward(x, s)
# --------------------------------------------------------------------------
def conv2d_weight_modulate(x, s, weight, *, demodulate=True, eps=EPS):
    """x: (B, Cin, H, W), s: (B, Cin), weight: (Cout, Cin, k, k) (unscaled)."""
    B, Cin, H, W = x.shape
    Cout, Cin2, k, k2 = weight.shape
    assert Cin2 == Cin and k == k2
    pad = (k - 1) // 2
    M = H * W

    c = 1.0 / math.sqrt(Cin * k * k)                        # EqualizedWeight
    w_scaled = weight.astype(jnp.float32) * c               # (Cout, Cin, k, k)
    w_kkoi = jnp.transpose(w_scaled, (2, 3, 0, 1)).astype(jnp.bfloat16)

    s = s.astype(jnp.float32)
    if demodulate:
        # sig_{b,o} = rsqrt( sum_i s_bi^2 * sum_{kh,kw} w_oi^2 + eps )
        w2 = jnp.sum(w_scaled * w_scaled, axis=(2, 3))      # (Cout, Cin)
        sig = jax.lax.rsqrt(
            jnp.einsum('bi,oi->bo', s * s, w2,
                       precision=jax.lax.Precision.HIGHEST) + eps)
    else:
        sig = jnp.ones((B, Cout), jnp.float32)

    # Lane padding of the staging scratch: multiple of 128 and >= the largest
    # flat tap offset at the H borders, so row overflow reads zeros and no row
    # mask is needed (only the k column masks below).
    padl = max(128, ((pad * (W + 1) + 127) // 128) * 128)
    assert padl >= pad * (W + 1), "flat-shift trick needs padl >= pad*(W+1)"

    # Column (W-border) masks, one per kernel column kw.
    cmasks = np.ones((k, 1, M), np.float32)
    for kw in range(k):
        dw = kw - pad
        mm = np.ones((H, W), np.float32)
        if dw < 0:
            mm[:, :(-dw)] = 0.0
        if dw > 0:
            mm[:, W - dw:] = 0.0
        cmasks[kw, 0, :] = mm.reshape(-1)
    cmasks = jnp.asarray(cmasks, jnp.bfloat16)

    # Cout tiling: 256 keeps weight/output blocks VMEM-friendly and the MXU
    # full at production channel counts; below that use the full Cout.
    co_t = Cout if Cout <= 256 else 256
    assert Cout % co_t == 0, "Cout must be a multiple of the Cout tile"
    n_co = Cout // co_t

    x3 = x.astype(jnp.bfloat16).reshape(B, Cin, M)          # free reshape
    s3 = s.reshape(B, Cin, 1)
    sig3 = sig.reshape(B, Cout, 1)

    # VMEM budget for the chosen tiles (double-buffered operands + persistent
    # scratch) with 2x headroom — do not rely on the 32 MiB scoped default.
    bf2, f4 = 2, 4
    operand_bytes = (Cin * M * bf2 + Cin * f4 + co_t * f4 +
                     k * k * co_t * Cin * bf2 + k * M * bf2 + co_t * M * f4)
    scratch_bytes = Cin * (M + 2 * padl) * bf2
    vmem_limit = int(min(max(2 * (2 * operand_bytes + scratch_bytes),
                             16 * 1024 * 1024), 96 * 1024 * 1024))

    kernel = functools.partial(_modconv_kernel, ksize=k, pad=pad,
                               width=W, padl=padl)

    out = pl.pallas_call(
        kernel,
        out_shape=jax.ShapeDtypeStruct((B, Cout, M), jnp.float32),
        grid=(B, n_co),
        in_specs=[
            pl.BlockSpec((1, Cin, M), lambda b, co: (b, 0, 0)),
            pl.BlockSpec((1, Cin, 1), lambda b, co: (b, 0, 0)),
            pl.BlockSpec((1, co_t, 1), lambda b, co: (b, co, 0)),
            pl.BlockSpec((k, k, co_t, Cin), lambda b, co: (0, 0, co, 0)),
            pl.BlockSpec((k, 1, M), lambda b, co: (0, 0, 0)),
        ],
        out_specs=pl.BlockSpec((1, co_t, M), lambda b, co: (b, co, 0)),
        scratch_shapes=[pltpu.VMEM((Cin, M + 2 * padl), jnp.bfloat16)],
        compiler_params=pltpu.CompilerParams(
            dimension_semantics=("parallel", "arbitrary"),
            vmem_limit_bytes=vmem_limit),
    )(x3, s3, sig3, w_kkoi, cmasks)

    return out.reshape(B, Cout, H, W)


# --------------------------------------------------------------------------
# Pure-JAX reference mirroring the torch module (per-batch grouped conv)
# --------------------------------------------------------------------------
def reference_modconv(x, s, weight, *, demodulate=True, eps=EPS):
    B, Cin, H, W = x.shape
    Cout, _, k, _ = weight.shape
    c = 1.0 / math.sqrt(Cin * k * k)
    pad = (k - 1) // 2
    w = weight.astype(jnp.float32) * c                      # (O, I, k, k)
    ws = w[None] * s.astype(jnp.float32)[:, None, :, None, None]
    if demodulate:
        sig = jax.lax.rsqrt(
            jnp.sum(ws ** 2, axis=(2, 3, 4), keepdims=True) + eps)
        ws = ws * sig
    outs = []
    for b in range(B):
        outs.append(jax.lax.conv_general_dilated(
            x[b:b + 1].astype(jnp.float32), ws[b], window_strides=(1, 1),
            padding=[(pad, pad), (pad, pad)],
            dimension_numbers=('NCHW', 'OIHW', 'NCHW'),
            precision=jax.lax.Precision.HIGHEST))
    return jnp.concatenate(outs, axis=0)


# --------------------------------------------------------------------------
if __name__ == "__main__":
    B, CIN, COUT, H, W, K = 2, 8, 16, 16, 16, 3

    key = jax.random.PRNGKey(0)
    kx, ks, kw = jax.random.split(key, 3)
    x = jax.random.normal(kx, (B, CIN, H, W), jnp.float32)
    s = jax.random.normal(ks, (B, CIN), jnp.float32) + 1.0
    weight = jax.random.normal(kw, (COUT, CIN, K, K), jnp.float32)

    # demodulate=True (the default path of the module)
    fwd = jax.jit(functools.partial(conv2d_weight_modulate, demodulate=True))
    y = fwd(x, s, weight)
    jax.block_until_ready(y)
    y_ref = reference_modconv(x, s, weight, demodulate=True)
    assert y.shape == (B, COUT, H, W), y.shape
    err = float(jnp.max(jnp.abs(y - y_ref)))
    assert jnp.allclose(y, y_ref, atol=5e-2, rtol=5e-2), err

    # demodulate=False path
    fwd_nd = jax.jit(functools.partial(conv2d_weight_modulate,
                                       demodulate=False))
    y2 = fwd_nd(x, s, weight)
    jax.block_until_ready(y2)
    y2_ref = reference_modconv(x, s, weight, demodulate=False)
    err2 = float(jnp.max(jnp.abs(y2 - y2_ref)))
    assert jnp.allclose(y2, y2_ref, atol=5e-2, rtol=5e-2), err2

    print("KERNEL_OK")
</pallas_src>

<mosaic_0001>
module attributes {stable_mosaic.version = 11 : i64} {
  func.func @_modconv_kernel(%arg0: i32, %arg1: i32, %arg2: memref<1x8x256xbf16, #tpu.memory_space<vmem>>, %arg3: memref<1x8x1xf32, #tpu.memory_space<vmem>>, %arg4: memref<1x16x1xf32, #tpu.memory_space<vmem>>, %arg5: memref<3x3x16x8xbf16, #tpu.memory_space<vmem>>, %arg6: memref<3x1x256xbf16, #tpu.memory_space<vmem>>, %arg7: memref<1x16x256xf32, #tpu.memory_space<vmem>>, %arg8: memref<8x512xbf16, #tpu.memory_space<vmem>>) attributes {dimension_semantics = [#tpu.dimension_semantics<parallel>, #tpu.dimension_semantics<arbitrary>], iteration_bounds = array<i64: 2, 1>, scalar_prefetch = 0 : i64, scratch_operands = 1 : i64, tpu.core_type = #tpu.core_type<tc>, window_params = [{transform_indices = @transform_0, window_bounds = array<i64: 1, 8, 256>}, {transform_indices = @transform_1, window_bounds = array<i64: 1, 8, 1>}, {transform_indices = @transform_2, window_bounds = array<i64: 1, 16, 1>}, {transform_indices = @transform_3, window_bounds = array<i64: 3, 3, 16, 8>}, {pipeline_mode = #tpu.pipeline_mode<synchronous>, transform_indices = @transform_4, window_bounds = array<i64: 3, 1, 256>}, {transform_indices = @transform_5, window_bounds = array<i64: 1, 16, 256>}]} {
    %c0_i32 = arith.constant 0 : i32
    %0 = arith.cmpi eq, %arg1, %c0_i32 : i32
    %1 = arith.extui %0 : i1 to i32
    %c0_i32_0 = arith.constant 0 : i32
    %2 = arith.cmpi ne, %1, %c0_i32_0 : i32
    scf.if %2 {
      %c0_76 = arith.constant 0 : index
      %c0_77 = arith.constant 0 : index
      %c0_78 = arith.constant 0 : index
      %80 = vector.load %arg2[%c0_76, %c0_77, %c0_78] : memref<1x8x256xbf16, #tpu.memory_space<vmem>>, vector<1x8x256xbf16>
      %81 = vector.shape_cast %80 : vector<1x8x256xbf16> to vector<8x256xbf16>
      %c0_79 = arith.constant 0 : index
      %c0_80 = arith.constant 0 : index
      %c0_81 = arith.constant 0 : index
      %82 = vector.load %arg3[%c0_79, %c0_80, %c0_81] : memref<1x8x1xf32, #tpu.memory_space<vmem>>, vector<1x8x1xf32>
      %83 = vector.shape_cast %82 : vector<1x8x1xf32> to vector<8x1xf32>
      %84 = arith.extf %81 : vector<8x256xbf16> to vector<8x256xf32>
      %85 = vector.broadcast %83 : vector<8x1xf32> to vector<8x256xf32>
      %86 = arith.mulf %84, %85 : vector<8x256xf32>
      %87 = arith.truncf %86 : vector<8x256xf32> to vector<8x256xbf16>
      %cst_82 = arith.constant 0.000000e+00 : bf16
      %88 = vector.broadcast %cst_82 : bf16 to vector<8x128xbf16>
      %c0_83 = arith.constant 0 : index
      %c0_84 = arith.constant 0 : index
      %89 = vector.load %arg8[%c0_83, %c0_84] : memref<8x512xbf16, #tpu.memory_space<vmem>>, vector<8x128xbf16>
      tpu.vector_store %arg8[%c0_83, %c0_84], %88 {strides = array<i32>} : memref<8x512xbf16, #tpu.memory_space<vmem>>, vector<8x128xbf16>,
      %c0_85 = arith.constant 0 : index
      %c384 = arith.constant 384 : index
      %90 = vector.load %arg8[%c0_85, %c384] : memref<8x512xbf16, #tpu.memory_space<vmem>>, vector<8x128xbf16>
      tpu.vector_store %arg8[%c0_85, %c384], %88 {strides = array<i32>} : memref<8x512xbf16, #tpu.memory_space<vmem>>, vector<8x128xbf16>,
      %c0_86 = arith.constant 0 : index
      %c128_87 = arith.constant 128 : index
      %91 = vector.load %arg8[%c0_86, %c128_87] : memref<8x512xbf16, #tpu.memory_space<vmem>>, vector<8x256xbf16>
      tpu.vector_store %arg8[%c0_86, %c128_87], %87 {strides = array<i32>} : memref<8x512xbf16, #tpu.memory_space<vmem>>, vector<8x256xbf16>,
    } else {
    }
    %cst = arith.constant 0.000000e+00 : f32
    %3 = vector.broadcast %cst : f32 to vector<16x256xf32>
    %c0 = arith.constant 0 : index
    %c111 = arith.constant 111 : index
    %4 = vector.load %arg8[%c0, %c111] : memref<8x512xbf16, #tpu.memory_space<vmem>>, vector<8x256xbf16>
    %c0_1 = arith.constant 0 : index
    %c0_2 = arith.constant 0 : index
    %c0_3 = arith.constant 0 : index
    %5 = vector.load %arg6[%c0_1, %c0_2, %c0_3] : memref<3x1x256xbf16, #tpu.memory_space<vmem>>, vector<1x1x256xbf16>
    %6 = vector.shape_cast %5 : vector<1x1x256xbf16> to vector<1x256xbf16>
    %7 = vector.broadcast %6 : vector<1x256xbf16> to vector<8x256xbf16>
    %8 = arith.mulf %4, %7 : vector<8x256xbf16>
    %c0_4 = arith.constant 0 : index
    %c0_5 = arith.constant 0 : index
    %c0_6 = arith.constant 0 : index
    %c0_7 = arith.constant 0 : index
    %9 = vector.load %arg5[%c0_4, %c0_5, %c0_6, %c0_7] : memref<3x3x16x8xbf16, #tpu.memory_space<vmem>>, vector<1x1x16x8xbf16>
    %10 = vector.shape_cast %9 : vector<1x1x16x8xbf16> to vector<16x8xbf16>
    %cst_8 = arith.constant dense<0.000000e+00> : vector<16x256xf32>
    %11 = tpu.matmul %10, %8, %cst_8 {dimension_numbers = #tpu.dot_dimension_numbers<[1], [0], [0], [1], [0, 0, 1, 1], [], []>} : vector<16x8xbf16>, vector<8x256xbf16>, vector<16x256xf32> -> vector<16x256xf32>
    %12 = arith.addf %3, %11 : vector<16x256xf32>
    %c0_9 = arith.constant 0 : index
    %c112 = arith.constant 112 : index
    %13 = vector.load %arg8[%c0_9, %c112] : memref<8x512xbf16, #tpu.memory_space<vmem>>, vector<8x256xbf16>
    %c0_10 = arith.constant 0 : index
    %c1 = arith.constant 1 : index
    %c0_11 = arith.constant 0 : index
    %c0_12 = arith.constant 0 : index
    %14 = vector.load %arg5[%c0_10, %c1, %c0_11, %c0_12] : memref<3x3x16x8xbf16, #tpu.memory_space<vmem>>, vector<1x1x16x8xbf16>
    %15 = vector.shape_cast %14 : vector<1x1x16x8xbf16> to vector<16x8xbf16>
    %cst_13 = arith.constant dense<0.000000e+00> : vector<16x256xf32>
    %16 = tpu.matmul %15, %13, %cst_13 {dimension_numbers = #tpu.dot_dimension_numbers<[1], [0], [0], [1], [0, 0, 1, 1], [], []>} : vector<16x8xbf16>, vector<8x256xbf16>, vector<16x256xf32> -> vector<16x256xf32>
    %17 = arith.addf %12, %16 : vector<16x256xf32>
    %c0_14 = arith.constant 0 : index
    %c113 = arith.constant 113 : index
    %18 = vector.load %arg8[%c0_14, %c113] : memref<8x512xbf16, #tpu.memory_space<vmem>>, vector<8x256xbf16>
    %c2 = arith.constant 2 : index
    %c0_15 = arith.constant 0 : index
    %c0_16 = arith.constant 0 : index
    %19 = vector.load %arg6[%c2, %c0_15, %c0_16] : memref<3x1x256xbf16, #tpu.memory_space<vmem>>, vector<1x1x256xbf16>
    %20 = vector.shape_cast %19 : vector<1x1x256xbf16> to vector<1x256xbf16>
    %21 = vector.broadcast %20 : vector<1x256xbf16> to vector<8x256xbf16>
    %22 = arith.mulf %18, %21 : vector<8x256xbf16>
    %c0_17 = arith.constant 0 : index
    %c2_18 = arith.constant 2 : index
    %c0_19 = arith.constant 0 : index
    %c0_20 = arith.constant 0 : index
    %23 = vector.load %arg5[%c0_17, %c2_18, %c0_19, %c0_20] : memref<3x3x16x8xbf16, #tpu.memory_space<vmem>>, vector<1x1x16x8xbf16>
    %24 = vector.shape_cast %23 : vector<1x1x16x8xbf16> to vector<16x8xbf16>
    %cst_21 = arith.constant dense<0.000000e+00> : vector<16x256xf32>
    %25 = tpu.matmul %24, %22, %cst_21 {dimension_numbers = #tpu.dot_dimension_numbers<[1], [0], [0], [1], [0, 0, 1, 1], [], []>} : vector<16x8xbf16>, vector<8x256xbf16>, vector<16x256xf32> -> vector<16x256xf32>
    %26 = arith.addf %17, %25 : vector<16x256xf32>
    %c0_22 = arith.constant 0 : index
    %c127 = arith.constant 127 : index
    %27 = vector.load %arg8[%c0_22, %c127] : memref<8x512xbf16, #tpu.memory_space<vmem>>, vector<8x256xbf16>
    %c0_23 = arith.constant 0 : index
    %c0_24 = arith.constant 0 : index
    %c0_25 = arith.constant 0 : index
    %28 = vector.load %arg6[%c0_23, %c0_24, %c0_25] : memref<3x1x256xbf16, #tpu.memory_space<vmem>>, vector<1x1x256xbf16>
    %29 = vector.shape_cast %28 : vector<1x1x256xbf16> to vector<1x256xbf16>
    %30 = vector.broadcast %29 : vector<1x256xbf16> to vector<8x256xbf16>
    %31 = arith.mulf %27, %30 : vector<8x256xbf16>
    %c1_26 = arith.constant 1 : index
    %c0_27 = arith.constant 0 : index
    %c0_28 = arith.constant 0 : index
    %c0_29 = arith.constant 0 : index
    %32 = vector.load %arg5[%c1_26, %c0_27, %c0_28, %c0_29] : memref<3x3x16x8xbf16, #tpu.memory_space<vmem>>, vector<1x1x16x8xbf16>
    %33 = vector.shape_cast %32 : vector<1x1x16x8xbf16> to vector<16x8xbf16>
    %cst_30 = arith.constant dense<0.000000e+00> : vector<16x256xf32>
    %34 = tpu.matmul %33, %31, %cst_30 {dimension_numbers = #tpu.dot_dimension_numbers<[1], [0], [0], [1], [0, 0, 1, 1], [], []>} : vector<16x8xbf16>, vector<8x256xbf16>, vector<16x256xf32> -> vector<16x256xf32>
    %35 = arith.addf %26, %34 : vector<16x256xf32>
    %c0_31 = arith.constant 0 : index
    %c128 = arith.constant 128 : index
    %36 = vector.load %arg8[%c0_31, %c128] : memref<8x512xbf16, #tpu.memory_space<vmem>>, vector<8x256xbf16>
    %c1_32 = arith.constant 1 : index
    %c1_33 = arith.constant 1 : index
    %c0_34 = arith.constant 0 : index
    %c0_35 = arith.constant 0 : index
    %37 = vector.load %arg5[%c1_32, %c1_33, %c0_34, %c0_35] : memref<3x3x16x8xbf16, #tpu.memory_space<vmem>>, vector<1x1x16x8xbf16>
    %38 = vector.shape_cast %37 : vector<1x1x16x8xbf16> to vector<16x8xbf16>
    %cst_36 = arith.constant dense<0.000000e+00> : vector<16x256xf32>
    %39 = tpu.matmul %38, %36, %cst_36 {dimension_numbers = #tpu.dot_dimension_numbers<[1], [0], [0], [1], [0, 0, 1, 1], [], []>} : vector<16x8xbf16>, vector<8x256xbf16>, vector<16x256xf32> -> vector<16x256xf32>
    %40 = arith.addf %35, %39 : vector<16x256xf32>
    %c0_37 = arith.constant 0 : index
    %c129 = arith.constant 129 : index
    %41 = vector.load %arg8[%c0_37, %c129] : memref<8x512xbf16, #tpu.memory_space<vmem>>, vector<8x256xbf16>
    %c2_38 = arith.constant 2 : index
    %c0_39 = arith.constant 0 : index
    %c0_40 = arith.constant 0 : index
    %42 = vector.load %arg6[%c2_38, %c0_39, %c0_40] : memref<3x1x256xbf16, #tpu.memory_space<vmem>>, vector<1x1x256xbf16>
    %43 = vector.shape_cast %42 : vector<1x1x256xbf16> to vector<1x256xbf16>
    %44 = vector.broadcast %43 : vector<1x256xbf16> to vector<8x256xbf16>
    %45 = arith.mulf %41, %44 : vector<8x256xbf16>
    %c1_41 = arith.constant 1 : index
    %c2_42 = arith.constant 2 : index
    %c0_43 = arith.constant 0 : index
    %c0_44 = arith.constant 0 : index
    %46 = vector.load %arg5[%c1_41, %c2_42, %c0_43, %c0_44] : memref<3x3x16x8xbf16, #tpu.memory_space<vmem>>, vector<1x1x16x8xbf16>
    %47 = vector.shape_cast %46 : vector<1x1x16x8xbf16> to vector<16x8xbf16>
    %cst_45 = arith.constant dense<0.000000e+00> : vector<16x256xf32>
    %48 = tpu.matmul %47, %45, %cst_45 {dimension_numbers = #tpu.dot_dimension_numbers<[1], [0], [0], [1], [0, 0, 1, 1], [], []>} : vector<16x8xbf16>, vector<8x256xbf16>, vector<16x256xf32> -> vector<16x256xf32>
    %49 = arith.addf %40, %48 : vector<16x256xf32>
    %c0_46 = arith.constant 0 : index
    %c143 = arith.constant 143 : index
    %50 = vector.load %arg8[%c0_46, %c143] : memref<8x512xbf16, #tpu.memory_space<vmem>>, vector<8x256xbf16>
    %c0_47 = arith.constant 0 : index
    %c0_48 = arith.constant 0 : index
    %c0_49 = arith.constant 0 : index
    %51 = vector.load %arg6[%c0_47, %c0_48, %c0_49] : memref<3x1x256xbf16, #tpu.memory_space<vmem>>, vector<1x1x256xbf16>
    %52 = vector.shape_cast %51 : vector<1x1x256xbf16> to vector<1x256xbf16>
    %53 = vector.broadcast %52 : vector<1x256xbf16> to vector<8x256xbf16>
    %54 = arith.mulf %50, %53 : vector<8x256xbf16>
    %c2_50 = arith.constant 2 : index
    %c0_51 = arith.constant 0 : index
    %c0_52 = arith.constant 0 : index
    %c0_53 = arith.constant 0 : index
    %55 = vector.load %arg5[%c2_50, %c0_51, %c0_52, %c0_53] : memref<3x3x16x8xbf16, #tpu.memory_space<vmem>>, vector<1x1x16x8xbf16>
    %56 = vector.shape_cast %55 : vector<1x1x16x8xbf16> to vector<16x8xbf16>
    %cst_54 = arith.constant dense<0.000000e+00> : vector<16x256xf32>
    %57 = tpu.matmul %56, %54, %cst_54 {dimension_numbers = #tpu.dot_dimension_numbers<[1], [0], [0], [1], [0, 0, 1, 1], [], []>} : vector<16x8xbf16>, vector<8x256xbf16>, vector<16x256xf32> -> vector<16x256xf32>
    %58 = arith.addf %49, %57 : vector<16x256xf32>
    %c0_55 = arith.constant 0 : index
    %c144 = arith.constant 144 : index
    %59 = vector.load %arg8[%c0_55, %c144] : memref<8x512xbf16, #tpu.memory_space<vmem>>, vector<8x256xbf16>
    %c2_56 = arith.constant 2 : index
    %c1_57 = arith.constant 1 : index
    %c0_58 = arith.constant 0 : index
    %c0_59 = arith.constant 0 : index
    %60 = vector.load %arg5[%c2_56, %c1_57, %c0_58, %c0_59] : memref<3x3x16x8xbf16, #tpu.memory_space<vmem>>, vector<1x1x16x8xbf16>
    %61 = vector.shape_cast %60 : vector<1x1x16x8xbf16> to vector<16x8xbf16>
    %cst_60 = arith.constant dense<0.000000e+00> : vector<16x256xf32>
    %62 = tpu.matmul %61, %59, %cst_60 {dimension_numbers = #tpu.dot_dimension_numbers<[1], [0], [0], [1], [0, 0, 1, 1], [], []>} : vector<16x8xbf16>, vector<8x256xbf16>, vector<16x256xf32> -> vector<16x256xf32>
    %63 = arith.addf %58, %62 : vector<16x256xf32>
    %c0_61 = arith.constant 0 : index
    %c145 = arith.constant 145 : index
    %64 = vector.load %arg8[%c0_61, %c145] : memref<8x512xbf16, #tpu.memory_space<vmem>>, vector<8x256xbf16>
    %c2_62 = arith.constant 2 : index
    %c0_63 = arith.constant 0 : index
    %c0_64 = arith.constant 0 : index
    %65 = vector.load %arg6[%c2_62, %c0_63, %c0_64] : memref<3x1x256xbf16, #tpu.memory_space<vmem>>, vector<1x1x256xbf16>
    %66 = vector.shape_cast %65 : vector<1x1x256xbf16> to vector<1x256xbf16>
    %67 = vector.broadcast %66 : vector<1x256xbf16> to vector<8x256xbf16>
    %68 = arith.mulf %64, %67 : vector<8x256xbf16>
    %c2_65 = arith.constant 2 : index
    %c2_66 = arith.constant 2 : index
    %c0_67 = arith.constant 0 : index
    %c0_68 = arith.constant 0 : index
    %69 = vector.load %arg5[%c2_65, %c2_66, %c0_67, %c0_68] : memref<3x3x16x8xbf16, #tpu.memory_space<vmem>>, vector<1x1x16x8xbf16>
    %70 = vector.shape_cast %69 : vector<1x1x16x8xbf16> to vector<16x8xbf16>
    %cst_69 = arith.constant dense<0.000000e+00> : vector<16x256xf32>
    %71 = tpu.matmul %70, %68, %cst_69 {dimension_numbers = #tpu.dot_dimension_numbers<[1], [0], [0], [1], [0, 0, 1, 1], [], []>} : vector<16x8xbf16>, vector<8x256xbf16>, vector<16x256xf32> -> vector<16x256xf32>
    %72 = arith.addf %63, %71 : vector<16x256xf32>
    %c0_70 = arith.constant 0 : index
    %c0_71 = arith.constant 0 : index
    %c0_72 = arith.constant 0 : index
    %73 = vector.load %arg4[%c0_70, %c0_71, %c0_72] : memref<1x16x1xf32, #tpu.memory_space<vmem>>, vector<1x16x1xf32>
    %74 = vector.shape_cast %73 : vector<1x16x1xf32> to vector<16x1xf32>
    %75 = vector.broadcast %74 : vector<16x1xf32> to vector<16x256xf32>
    %76 = arith.mulf %72, %75 : vector<16x256xf32>
    %c0_73 = arith.constant 0 : index
    %c0_74 = arith.constant 0 : index
    %c0_75 = arith.constant 0 : index
    %77 = vector.load %arg7[%c0_73, %c0_74, %c0_75] : memref<1x16x256xf32, #tpu.memory_space<vmem>>, vector<1x16x256xf32>
    %78 = vector.shape_cast %77 : vector<1x16x256xf32> to vector<16x256xf32>
    %79 = vector.shape_cast %76 : vector<16x256xf32> to vector<1x16x256xf32>
    tpu.vector_store %arg7[%c0_73, %c0_74, %c0_75], %79 {strides = array<i32>} : memref<1x16x256xf32, #tpu.memory_space<vmem>>, vector<1x16x256xf32>,
    return
  }
  func.func @transform_0(%arg0: i32, %arg1: i32) -> (i32, i32, i32) {
    %c0_i32 = arith.constant 0 : i32
    %c0_i32_0 = arith.constant 0 : i32
    %c0_i32_1 = arith.constant 0 : i32
    return %arg0, %c0_i32, %c0_i32_0 : i32, i32, i32
  }
  func.func @transform_1(%arg0: i32, %arg1: i32) -> (i32, i32, i32) {
    %c0_i32 = arith.constant 0 : i32
    %c0_i32_0 = arith.constant 0 : i32
    %c0_i32_1 = arith.constant 0 : i32
    return %arg0, %c0_i32, %c0_i32_0 : i32, i32, i32
  }
  func.func @transform_2(%arg0: i32, %arg1: i32) -> (i32, i32, i32) {
    %c0_i32 = arith.constant 0 : i32
    %c0_i32_0 = arith.constant 0 : i32
    return %arg0, %arg1, %c0_i32 : i32, i32, i32
  }
  func.func @transform_3(%arg0: i32, %arg1: i32) -> (i32, i32, i32, i32) {
    %c0_i32 = arith.constant 0 : i32
    %c0_i32_0 = arith.constant 0 : i32
    %c0_i32_1 = arith.constant 0 : i32
    %c0_i32_2 = arith.constant 0 : i32
    return %c0_i32, %c0_i32_0, %arg1, %c0_i32_1 : i32, i32, i32, i32
  }
  func.func @transform_4(%arg0: i32, %arg1: i32) -> (i32, i32, i32) {
    %c0_i32 = arith.constant 0 : i32
    %c0_i32_0 = arith.constant 0 : i32
    %c0_i32_1 = arith.constant 0 : i32
    %c0_i32_2 = arith.constant 0 : i32
    return %c0_i32, %c0_i32_0, %c0_i32_1 : i32, i32, i32
  }
  func.func @transform_5(%arg0: i32, %arg1: i32) -> (i32, i32, i32) {
    %c0_i32 = arith.constant 0 : i32
    %c0_i32_0 = arith.constant 0 : i32
    return %arg0, %arg1, %c0_i32 : i32, i32, i32
  }
}

</mosaic_0001>

<bundles_post_ra>
// kernel: conv2d_weight_modulate.1
= control target key start
LH: loop header
LB: loop body
LE: loop exit
PB: predicated region body
PF: predicated region fallthrough
CT: control target
= control target key end

     0   :  { %s1597_s18 = smov 0   ;;  %s1599_s19 = smov 0   ;;  %s1777_s0 = inlined_call_operand.vmem [shape: bf16[2,8,256], index: 0, kind: input, shape index: {}]   ;;  %s1778_s1 = inlined_call_operand.vmem [shape: f32[2,8,1], index: 1, kind: input, shape index: {}]   ;;  %s1779_s2 = inlined_call_operand.vmem [shape: f32[2,16,1], index: 2, kind: input, shape index: {}]   ;;  %s1780_s3 = inlined_call_operand.vmem [shape: bf16[3,3,16,8], index: 3, kind: input, shape index: {}]   ;;  %s1781_s4 = inlined_call_operand.vmem [shape: bf16[3,1,256], index: 4, kind: input, shape index: {}]   ;;  %s1782_s5 = inlined_call_operand.vmem [shape: f32[2,16,256], index: 5, kind: output, shape index: {}]  }
   0x1   :  { %s1601_s20 = smov 0  }
   0x2 LB: > { %s27_s21 = sadd.s32 1, %s1551_s19  ;;  %p1361_p0 = scmp.ge.s32.totalorder %s1555_s20, 1  ;;  %s1555_s20 = sphi %s1601_s20, %s15_s20   ;;  %s1551_s19 = sphi %s1599_s19, %s1784_s19   ;;  %s1547_s18 = sphi %s1597_s18, %s1783_s18  }
   0x3   : > { %p29_p1 = scmp.ge.s32.totalorder %s27_s21, 2  ;;  %p238_p2 = scmp.lt.s32.totalorder %s1555_s20, 3 }
   0x5   : > { %s1786_s21 = smov (%p29_p1, %s27_s21), 0  ;;  %p239_p3 = pnand %p1361_p0, %p238_p2 }
   0x6   : > { %p289_p4 = scmp.lt.s32.totalorder (!%p239_p3), %s1547_s18, 1  ;;  %v1370_v0 = vld.sshfl [vmem:[%s1781_s4] sm:$0x11 pattern:$0x75316420] (!%p239_p3)  ;;  %v367_v1 = vlaneseq (!%p239_p3)  ;;  %v1557_v2 = vmov (!%p239_p3), 0  }
   0x7   : > { %242 = sbr.rel (%p239_p3) target bundleno = 544 (0x220), region = 40  ;;  %1516 = vset.pattern.permute.xlu0 (!%p239_p3), %v1557_v2  ;;  %343 = vst [vmem:[#allocation2] sm:$0xf] (!%p239_p3), %v1557_v2  ;;  %344 = vst [vmem:[#allocation2 + $0xc] sm:$0xf] (!%p239_p3), %v1557_v2  ;;  %842 = vmatprep.mubr.bf16.mxu0 (!%p239_p3), %v1557_v2  ;;  %v363_v7 = vcombine.high (!%p239_p3), %v1370_v0, %v1370_v0  ;;  %s1559_s30 = smov (!%p239_p3), 111  }
   0x8   : > { %v1558_v3 = vmov (!%p239_p3), 1966171168   ;;  %v368_v5 = vshrl.u32 (!%p239_p3), %v367_v1, 7  ;;  %476 = vmatprep.mubr.bf16.mxu1 (!%p239_p3), %v1557_v2  ;;  %1517 = vset.pattern.permute.xlu1 (!%p239_p3), %v1557_v2  ;;  %s1560_s6 = smov (!%p239_p3), 1   ;;  %s1561_s7 = smov (!%p239_p3), 15   ;;  %vm437_vm0 = vcmask (!%p239_p3), 1043456  }
   0x9   : > { %v365_v4 = vunpack.c.l.s4 (!%p239_p3), %v1558_v3  ;;  %v1387_v6 = vld.sshfl [vmem:[%s1781_s4 + $0x4] sm:$0x11 pattern:$0x75316420] (!%p239_p3)  ;;  %s1562_s8 = smov (!%p239_p3), 113   ;;  %s1563_s9 = smov (!%p239_p3), 127  }
   0xa   : > { %v571_v9 = vcombine.high (!%p239_p3), %v1387_v6, %v1387_v6  ;;  %v383_v12 = vsub.s32 (!%p239_p3), 0, %v368_v5  ;;  %s1564_s10 = smov (!%p239_p3), 17   ;;  %vm728_vm1 = vcmask (!%p239_p3), 7168   ;;  %v1522_v42 = vld [vmem:[%s1780_s3 + $0x20] sm:$0xff] (!%p239_p3)   ;;  %vm433_vm2 = vcmask (!%p239_p3), 64512   ;;  %s1565_s16 = smov (!%p239_p3), 16  }
   0xb   : > { %v366_v8 = vunpack.c.0.s8 (!%p239_p3), %v365_v4  ;;  %vm400_vm3 = vcmask (!%p239_p3), 908288   ;;  %vm636_vm4 = vcmask (!%p239_p3), 121856   ;;  %vm608_vm5 = vcmask (!%p239_p3), 924672   ;;  %s1566_s17 = smov (!%p239_p3), 112  }
   0xc   : > { %vm700_vm6 = vcmask (!%p239_p3), 1039360   ;;  %vm506_vm7 = vcmask (!%p239_p3), 138240   ;;  %vm430_vm8 = vcmask (!%p239_p3), 130048   ;;  %vm1057_vm9 = vcmask (!%p239_p3), 916480  }
   0xd   : > { %v369_v11 = vsub.s32 (!%p239_p3), %v366_v8, %v368_v5 }
   0xe   : > { %s1788_s18 = smov (!%p289_p4, %s1547_s18), 1  ;;  %v1648_v34 = vld [vmem:[#allocation2 + $0xc] sm:$0xf] }
   0xf   : > { %s1446_s26 = sshll.u32 %s1788_s18, 3  ;;  %v370_v13 = vrot.slane %v1370_v0, %v369_v11  ;;  %v377_v14 = vrot.slane %v363_v7, %v369_v11  ;;  %v578_v15 = vrot.slane %v1387_v6, %v369_v11  ;;  %v585_v16 = vrot.slane %v571_v9, %v369_v11  ;;  %s1447_s22 = sshll.u32 %s1788_s18, 4 }
  0x10   : > { %s297_s29 = scalar_lea.vmem %s1778_s1, %s1446_s26  ;;  %s293_s13 = scalar_lea.vmem %s1777_s0, %s1446_s26  ;;  %v1433_v11 = vcombine.low %v1648_v34, %v1648_v34 }
  0x11   : > { %v331_v10 = vld [vmem:[%s297_s29] sm:$0xff]  ;;  %v379_v17 = vpack.i.b16 %v370_v13, %v370_v13  ;;  %v386_v18 = vpack.i.b16 %v377_v14, %v377_v14  ;;  %v587_v19 = vpack.i.b16 %v578_v15, %v578_v15  ;;  %v594_v20 = vpack.i.b16 %v585_v16, %v585_v16  ;;  %s306_s25 = scalar_lea.vmem %s1779_s2, %s1447_s22 }
  0x12   : > { %336 = vperm.xlu0 %1516, %v331_v10   ;;  %v330_v27 = vld [vmem:[%s293_s13] sm:$0xff] }
  0x13   : > { %v384_v21 = vrot.slane %v379_v17, %v383_v12  ;;  %v391_v22 = vrot.slane %v386_v18, %v383_v12  ;;  %v592_v23 = vrot.slane %v587_v19, %v383_v12  ;;  %v599_v24 = vrot.slane %v594_v20, %v383_v12 }
  0x14   : > { %v332_v28 = vunpack.c.l.bf16 %v330_v27  ;;  %v333_v29 = vunpack.c.h.bf16 %v330_v27 }
  0x15   : > { %v1371_v25 = vcombine.low %v384_v21, %v391_v22  ;;  %v1388_v26 = vcombine.low %v592_v23, %v599_v24 }
  0x17   : > { %397 = vrot.lane.b32.xlu1 %v1371_v25, %s1559_s30  ;;  %859 = vrot.lane.b32.xlu0 %v1388_v26, %s1560_s6 }
  0x1b   : > { %947 = vrot.lane.b32.xlu1 %v1371_v25, %s1561_s7  ;;  %605 = vrot.lane.b32.xlu0 %v1388_v26, %s1562_s8 }
  0x1f   : > { %697 = vrot.lane.b32.xlu1 %v1371_v25, %s1563_s9  ;;  %1116 = vrot.lane.b32.xlu0 %v1388_v26, %s1564_s10 }
  0x89   : > { %v398_v36 = vpop.permute.xlu1 %397 }
  0x8a   : > { %v399_v50 = vrot.slane %v398_v36, 4 }
  0x8c   : > { %v401_v55 = vsel %vm400_vm3, %v399_v50, %v398_v36 }
  0x8d   : > { %v948_v45 = vpop.permute.xlu1 %947 }
  0x8e   : > { %v949_v48 = vrot.slane %v948_v45, 4 }
  0x90   : > { %v954_v53 = vmul.bf16 %v949_v48, %v1648_v34  ;;  %v950_v59 = vsel %vm636_vm4, %v949_v48, %v948_v45 }
  0x91   : > { %v337_v30 = vpop.permute.xlu0 %336  ;;  %v698_v6 = vpop.permute.xlu1 %697 }
  0x92   : > { %v339_v31 = vmul.f32 %v337_v30, %v332_v28  ;;  %v340_v32 = vmul.f32 %v337_v30, %v333_v29  ;;  %v1425_v57 = vcombine.low %v954_v53, %v954_v53  ;;  %v699_v8 = vrot.slane %v698_v6, 4  ;;  %v1205_v30 = vld [vmem:[%s306_s25 + $0x8] sm:$0xff] }
  0x94   : > { %v1646_v33 = vpack.c.bf16 %v340_v32, %v339_v31  ;;  %v1651_v38 = vpack.c.bf16 %v340_v32, %v340_v32  ;;  %v1532_v39 = vpack.c.bf16 %v339_v31, %v339_v31  ;;  %v701_v13 = vsel %vm700_vm6, %v699_v8, %v698_v6  ;;  %v1204_v32 = vld [vmem:[%s306_s25] sm:$0xff] }
  0x95   : > { %v860_v35 = vpop.permute.xlu0 %859 }
  0x96   : > { %351 = vst [vmem:[#allocation2 + $0x4] sm:$0xff] %v1646_v33  ;;  %v861_v37 = vrot.slane %v860_v35, 4  ;;  %1410 = vmatprep.subr.msk.bf16.mxu0 %vm437_vm0, %v1651_v38  ;;  %v805_v41 = vsel %vm437_vm0, %v1532_v39, 0  ;;  %v953_v61 = vmul.bf16 %v1646_v33, %v950_v59 }
  0x97   : > { %811 = vmatpush1.bf16.msra.mxu0 %v805_v41  ;;  %v1523_v41 = vld [vmem:[%s1780_s3 + $0x8] sm:$0xff]  }
  0x98   : > { %v866_v40 = vmul.bf16 %v861_v37, %v1648_v34  ;;  %v862_v44 = vsel %vm728_vm1, %v861_v37, %v860_v35  ;;  %v1423_v3 = vcombine.low %v953_v61, %v953_v61  ;;  %v1424_v9 = vcombine.high %v953_v61, %v953_v61  ;;  %v1526_v61 = vld [vmem:[%s1780_s3 + $0x30] sm:$0xff]  }
  0x99   : > { %v865_v47 = vmul.bf16 %v1646_v33, %v862_v44  ;;  %v606_v1 = vpop.permute.xlu0 %605 }
  0x9a   : > { %v1417_v43 = vcombine.low %v866_v40, %v866_v40  ;;  %1411 = vmatmul.mubr.msk.bf16.vlgmr.msra.gmra.mrb[0].mxu0 %vm433_vm2, %v1522_v42  ;;  %v607_v4 = vrot.slane %v606_v1, 4 }
  0x9b   : > { %932 = vmatprep.mubr.bf16.mxu0 %v1557_v2  ;;  %v1415_v54 = vcombine.low %v865_v47, %v865_v47  ;;  %v1416_v60 = vcombine.high %v865_v47, %v865_v47  ;;  %v1524_v47 = vld [vmem:[%s1780_s3 + $0x28] sm:$0xff]  }
  0x9c   : > { %887 = vrot.lane.b32.xlu0 %v1417_v43, %s1563_s9  ;;  %v609_v7 = vsel %vm608_vm5, %v607_v4, %v606_v1 }
  0x9d   : > { %v352_v46 = vld [vmem:[#allocation2] sm:$0xff]  ;;  %v353_v52 = vld [vmem:[#allocation2 + $0x8] sm:$0xf]  ;;  %v1117_v10 = vpop.permute.xlu0 %1116 }
  0x9e   : > { %v1376_v49 = vcombine.high %v352_v46, %v352_v46  ;;  %v1375_v51 = vcombine.low %v352_v46, %v352_v46  ;;  %v1377_v56 = vcombine.low %v353_v52, %v353_v52  ;;  %v404_v58 = vmul.bf16 %v401_v55, %v352_v46  ;;  %v696_v23 = vld [vmem:[#allocation2 + $0x8] sm:$0xf]  ;;  %v1525_v55 = vld [vmem:[%s1780_s3] sm:$0xff]  }
  0x9f   : > { %v405_v63 = vmul.bf16 %v399_v50, %v353_v52  ;;  %v612_v12 = vmul.bf16 %v609_v7, %v352_v46  ;;  %v1118_v14 = vrot.slane %v1117_v10, 4  ;;  %v704_v15 = vmul.bf16 %v701_v13, %v352_v46 }
  0xa0   : > { %426 = vrot.lane.b32.xlu0 %v1376_v49, %s1565_s16  ;;  %424 = vrot.lane.b32.xlu1 %v1375_v51, %s1565_s16  ;;  %v1382_v62 = vcombine.high %v404_v58, %v404_v58  ;;  %v1381_v0 = vcombine.low %v404_v58, %v404_v58  ;;  %v613_v17 = vmul.bf16 %v607_v4, %v353_v52 }
  0xa1   : > { %v1383_v5 = vcombine.low %v405_v63, %v405_v63  ;;  %v1393_v16 = vcombine.high %v612_v12, %v612_v12  ;;  %v1119_v18 = vsel %vm506_vm7, %v1118_v14, %v1117_v10  ;;  %v1392_v19 = vcombine.low %v612_v12, %v612_v12  ;;  %v1528_v12 = vld [vmem:[%s1780_s3 + $0x38] sm:$0xff]  }
  0xa2   : > { %v1122_v20 = vmul.bf16 %v1646_v33, %v1119_v18  ;;  %v1401_v21 = vcombine.high %v704_v15, %v704_v15  ;;  %v1394_v22 = vcombine.low %v613_v17, %v613_v17  ;;  %v1123_v24 = vmul.bf16 %v1118_v14, %v1648_v34 }
  0xa3   : > { %v705_v26 = vmul.bf16 %v699_v8, %v696_v23  ;;  %v1400_v27 = vcombine.low %v704_v15, %v704_v15 }
  0xa4   : > { %883 = vrot.lane.b32.xlu0 %v1415_v54, %s1563_s9  ;;  %428 = vrot.lane.b32.xlu1 %v1377_v56, %s1565_s16  ;;  %v1439_v25 = vcombine.low %v1122_v20, %v1122_v20  ;;  %v1441_v28 = vcombine.low %v1123_v24, %v1123_v24  ;;  %v1440_v31 = vcombine.high %v1122_v20, %v1122_v20  ;;  %v1530_v24 = vld [vmem:[%s1780_s3 + $0x40] sm:$0xff]  }
  0xa5   : > { %v1402_v29 = vcombine.low %v705_v26, %v705_v26 }
  0xa8   : > { %975 = vrot.lane.b32.xlu0 %v1425_v57, %s1562_s8  ;;  %885 = vrot.lane.b32.xlu1 %v1416_v60, %s1563_s9 }
  0xac   : > { %502 = vrot.lane.b32.xlu0 %v1382_v62, %s1564_s10  ;;  %500 = vrot.lane.b32.xlu1 %v1381_v0, %s1564_s10 }
  0xb0   : > { %971 = vrot.lane.b32.xlu0 %v1423_v3, %s1562_s8  ;;  %504 = vrot.lane.b32.xlu1 %v1383_v5, %s1564_s10 }
  0xb4   : > { %1051 = vrot.lane.b32.xlu0 %v1532_v39, %s1566_s17  ;;  %973 = vrot.lane.b32.xlu1 %v1424_v9, %s1562_s8 }
  0xb8   : > { %1055 = vrot.lane.b32.xlu0 %v1433_v11, %s1566_s17  ;;  %1053 = vrot.lane.b32.xlu1 %v1651_v38, %s1566_s17  ;;  %v1527_v11 = vld [vmem:[%s1780_s3 + $0x10] sm:$0xff]   ;;  %s1448_s17 = sshll.u32 %s1788_s18, 5 }
  0xb9   : > { %s323_s24 = scalar_lea.vmem %s1782_s5, %s1448_s17 }
  0xbc   : > { %632 = vrot.lane.b32.xlu0 %v1393_v16, %s1561_s7  ;;  %630 = vrot.lane.b32.xlu1 %v1392_v19, %s1561_s7 }
  0xc0   : > { %724 = vrot.lane.b32.xlu0 %v1401_v21, %s1560_s6  ;;  %634 = vrot.lane.b32.xlu1 %v1394_v22, %s1561_s7 }
  0xc4   : > { %1140 = vrot.lane.b32.xlu0 %v1439_v25, %s1559_s30  ;;  %722 = vrot.lane.b32.xlu1 %v1400_v27, %s1560_s6 }
  0xc8   : > { %1144 = vrot.lane.b32.xlu0 %v1441_v28, %s1559_s30  ;;  %726 = vrot.lane.b32.xlu1 %v1402_v29, %s1560_s6 }
  0xcc   : > { %1213 = vperm.xlu0 %1516, %v1205_v30   ;;  %1142 = vrot.lane.b32.xlu1 %v1440_v31, %s1559_s30 }
  0xd0   : > { %1208 = vperm.xlu1 %1517, %v1204_v32  }
 0x10e   : > { %v888_v33 = vpop.permute.xlu0 %887 }
 0x112   : > { %v427_v34 = vpop.permute.xlu0 %426  ;;  %v425_v35 = vpop.permute.xlu1 %424 }
 0x113   : > { %v431_v37 = vsel %vm430_vm8, %v425_v35, %v427_v34 }
 0x114   : > { %v439_v40 = vsel %vm437_vm0, %v431_v37, 0 }
 0x116   : > { %v884_v36 = vpop.permute.xlu0 %883  ;;  %v429_v38 = vpop.permute.xlu1 %428 }
 0x117   : > { %v432_v39 = vsel %vm430_vm8, %v427_v34, %v429_v38 }
 0x118   : > { %1378 = vmatprep.subr.msk.bf16.mxu1 %vm437_vm0, %v432_v39 }
 0x119   : > { %445 = vmatpush1.bf16.msra.mxu1 %v439_v40 }
 0x11a   : > { %v976_v42 = vpop.permute.xlu0 %975  ;;  %v886_v43 = vpop.permute.xlu1 %885 }
 0x11b   : > { %v889_v44 = vsel %vm700_vm6, %v884_v36, %v886_v43  ;;  %v890_v45 = vsel %vm700_vm6, %v886_v43, %v888_v33 }
 0x11c   : > { %v895_v46 = vsel %vm437_vm0, %v889_v44, 0  ;;  %1418 = vmatprep.subr.msk.bf16.mxu0 %vm437_vm0, %v890_v45  ;;  %1379 = vmatmul.mubr.msk.bf16.vlgmr.msra.gmra.mrb[0].mxu1 %vm433_vm2, %v1523_v41 }
 0x11d   : > { %901 = vmatpush1.bf16.msra.mxu0 %v895_v46  ;;  %550 = vmatprep.mubr.bf16.mxu1 %v1557_v2 }
 0x11e   : > { %v503_v48 = vpop.permute.xlu0 %502  ;;  %v501_v49 = vpop.permute.xlu1 %500 }
 0x11f   : > { %v507_v50 = vsel %vm506_vm7, %v501_v49, %v503_v48 }
 0x120   : > { %1419 = vmatmul.mubr.msk.bf16.vlgmr.msra.gmra.mrb[0].mxu0 %vm433_vm2, %v1524_v47  ;;  %v513_v54 = vsel %vm437_vm0, %v507_v50, 0 }
 0x121   : > { %1020 = vmatprep.mubr.bf16.mxu0 %v1557_v2 }
 0x122   : > { %v972_v51 = vpop.permute.xlu0 %971  ;;  %v505_v52 = vpop.permute.xlu1 %504 }
 0x123   : > { %v508_v53 = vsel %vm506_vm7, %v503_v48, %v505_v52 }
 0x124   : > { %1384 = vmatprep.subr.msk.bf16.mxu1 %vm437_vm0, %v508_v53 }
 0x125   : > { %519 = vmatpush1.bf16.msra.mxu1 %v513_v54 }
 0x126   : > { %v1052_v56 = vpop.permute.xlu0 %1051  ;;  %v974_v57 = vpop.permute.xlu1 %973 }
 0x127   : > { %v977_v58 = vsel %vm608_vm5, %v972_v51, %v974_v57  ;;  %v978_v59 = vsel %vm608_vm5, %v974_v57, %v976_v42 }
 0x128   : > { %v983_v60 = vsel %vm437_vm0, %v977_v58, 0  ;;  %1426 = vmatprep.subr.msk.bf16.mxu0 %vm437_vm0, %v978_v59  ;;  %1385 = vmatmul.mubr.msk.bf16.vlgmr.msra.gmra.mrb[0].mxu1 %vm433_vm2, %v1525_v55 }
 0x129   : > { %989 = vmatpush1.bf16.msra.mxu0 %v983_v60  ;;  %680 = vmatprep.mubr.bf16.mxu1 %v1557_v2 }
 0x12a   : > { %v1056_v62 = vpop.permute.xlu0 %1055  ;;  %v1054_v63 = vpop.permute.xlu1 %1053 }
 0x12b   : > { %v1058_v0 = vsel %vm1057_vm9, %v1052_v56, %v1054_v63  ;;  %v1059_v1 = vsel %vm1057_vm9, %v1054_v63, %v1056_v62 }
 0x12c   : > { %v1064_v3 = vsel %vm437_vm0, %v1058_v0, 0  ;;  %1427 = vmatmul.mubr.msk.bf16.vlgmr.msra.gmra.mrb[0].mxu0 %vm433_vm2, %v1526_v61  ;;  %1434 = vmatprep.subr.msk.bf16.mxu0 %vm437_vm0, %v1059_v1 }
 0x12d   : > { %1070 = vmatpush1.bf16.msra.mxu0 %v1064_v3  ;;  %1101 = vmatprep.mubr.bf16.mxu0 %v1557_v2 }
 0x12e   : > { %v633_v4 = vpop.permute.xlu0 %632  ;;  %v631_v5 = vpop.permute.xlu1 %630 }
 0x12f   : > { %v637_v6 = vsel %vm636_vm4, %v631_v5, %v633_v4 }
 0x130   : > { %v643_v10 = vsel %vm437_vm0, %v637_v6, 0 }
 0x132   : > { %v725_v7 = vpop.permute.xlu0 %724  ;;  %v635_v8 = vpop.permute.xlu1 %634 }
 0x133   : > { %v638_v9 = vsel %vm636_vm4, %v633_v4, %v635_v8 }
 0x134   : > { %1395 = vmatprep.subr.msk.bf16.mxu1 %vm437_vm0, %v638_v9 }
 0x135   : > { %649 = vmatpush1.bf16.msra.mxu1 %v643_v10 }
 0x136   : > { %v723_v13 = vpop.permute.xlu1 %722  ;;  %v1141_v14 = vpop.permute.xlu0 %1140 }
 0x137   : > { %v729_v15 = vsel %vm728_vm1, %v723_v13, %v725_v7 }
 0x138   : > { %1396 = vmatmul.mubr.msk.bf16.vlgmr.msra.gmra.mrb[0].mxu1 %vm433_vm2, %v1527_v11  ;;  %1435 = vmatmul.mubr.msk.bf16.vlgmr.msra.gmra.mrb[0].mxu0 %vm433_vm2, %v1528_v12  ;;  %v735_v18 = vsel %vm437_vm0, %v729_v15, 0 }
 0x139   : > { %772 = vmatprep.mubr.bf16.mxu1 %v1557_v2  ;;  %1189 = vmatprep.mubr.bf16.mxu0 %v1557_v2  ;;  %v1529_v2 = vld [vmem:[%s1780_s3 + $0x18] sm:$0xff]  }
 0x13a   : > { %v727_v16 = vpop.permute.xlu1 %726  ;;  %v1145_v19 = vpop.permute.xlu0 %1144 }
 0x13b   : > { %v730_v17 = vsel %vm728_vm1, %v725_v7, %v727_v16 }
 0x13c   : > { %1403 = vmatprep.subr.msk.bf16.mxu1 %vm437_vm0, %v730_v17 }
 0x13d   : > { %741 = vmatpush1.bf16.msra.mxu1 %v735_v18 }
 0x13e   : > { %v1143_v20 = vpop.permute.xlu1 %1142 }
 0x13f   : > { %v1146_v21 = vsel %vm400_vm3, %v1141_v14, %v1143_v20  ;;  %v1147_v22 = vsel %vm400_vm3, %v1143_v20, %v1145_v19 }
 0x140   : > { %v1152_v23 = vsel %vm437_vm0, %v1146_v21, 0  ;;  %1442 = vmatprep.subr.msk.bf16.mxu0 %vm437_vm0, %v1147_v22 }
 0x141   : > { %1158 = vmatpush1.bf16.msra.mxu0 %v1152_v23 }
 0x144   : > { %1404 = vmatmul.mubr.msk.bf16.vlgmr.msra.gmra.mrb[0].mxu1 %vm433_vm2, %v1529_v2  ;;  %1443 = vmatmul.mubr.msk.bf16.vlgmr.msra.gmra.mrb[0].mxu0 %vm433_vm2, %v1530_v24 }
 0x14b   : > { %v1214_v38 = vpop.permute.xlu0 %1213 }
 0x14f   : > { %v1209_v25 = vpop.permute.xlu1 %1208 }
 0x217   : > { %v774_v26 = vpop.f32.mrb[0].mxu1  ;;  %v1191_v27 = vpop.f32.mrb[0].mxu0 }
 0x218   : > { %v1450_v28 = vadd.f32 %v1191_v27, %v774_v26  ;;  %v776_v29 = vpop.f32.mrb[1].mxu1  ;;  %v1193_v30 = vpop.f32.mrb[1].mxu0 }
 0x219   : > { %v1451_v31 = vadd.f32 %v1193_v30, %v776_v29  ;;  %v778_v32 = vpop.f32.mrb[2].mxu1  ;;  %v1195_v33 = vpop.f32.mrb[2].mxu0 }
 0x21a   : > { %v1452_v34 = vadd.f32 %v1195_v33, %v778_v32  ;;  %v1216_v35 = vmul.f32 %v1450_v28, %v1209_v25  ;;  %v780_v36 = vpop.f32.mrb[3].mxu1  ;;  %v1197_v37 = vpop.f32.mrb[3].mxu0 }
 0x21b   : > { %v1217_v39 = vmul.f32 %v1451_v31, %v1209_v25  ;;  %v1453_v40 = vadd.f32 %v1197_v37, %v780_v36 }
 0x21c   : > { %v1218_v41 = vmul.f32 %v1452_v34, %v1214_v38  ;;  %1220 = vst [vmem:[%s323_s24] sm:$0xff] %v1216_v35 }
 0x21d   : > { %1221 = vst [vmem:[%s323_s24 + $0x8] sm:$0xff] %v1217_v39  ;;  %v1219_v42 = vmul.f32 %v1453_v40, %v1214_v38 }
 0x21e   : > { %1222 = vst [vmem:[%s323_s24 + $0x10] sm:$0xff] %v1218_v41 }
 0x21f   : > { %1223 = vst [vmem:[%s323_s24 + $0x18] sm:$0xff] %v1219_v42 }
 0x220 PF: > { %s15_s20 = sadd.s32 1, %s1555_s20   ;;  %s1783_s18 = smov %s1551_s19 }
 0x221   : > { %p12_p5 = scmp.ge.s32.totalorder %s15_s20, 4   ;;  %s1784_s19 = smov %s1786_s21 }
 0x223   :  { %14 = sbr.rel (!%p12_p5) target bundleno = 2 (0x2), region = 92 }

</bundles_post_ra>
